<compile_context>
chip_gen: v5e
topology: v5e:2x2
jax: 0.10.0
libtpu: 0.0.40
codegen_flags: <defaults>
</compile_context>

<pallas_src>
import functools

import jax
import jax.numpy as jnp
from jax.experimental import pallas as pl
from jax.experimental.pallas import tpu as pltpu

HIDDEN = 128
LEAKY_SLOPE = 0.01
ELU_ALPHA = 0.1
LANE = 128
TILE_B_TARGET = 512   # long M stream: amortizes per-step cost & MXU RHS pushes
TILE_B_ALIGN = 16     # keeps bf16 output tiles sublane-pack friendly


def _round_up(n, m):
    return ((n + m - 1) // m) * m


def _leaky_relu(v):
    # max(v, 0.01*v) == LeakyReLU(0.01) for slope in (0,1); mul+max instead of cmp+sel+mul.
    return jnp.maximum(v, LEAKY_SLOPE * v)


def _elu(v):
    # ELU(alpha=0.1): x if x > 0 else alpha * (exp(x) - 1)
    return jnp.where(v > 0.0, v, ELU_ALPHA * (jnp.exp(v) - 1.0))


def mlp_kernel(x_ref,
               w1_ref, b1_ref,
               w2_ref, b2_ref,
               w3_ref, b3_ref,
               w4_ref, b4_ref,
               w5_ref, b5_ref,
               o_ref):
    # Fully fused MLP hot path: 5 MXU matmuls (bf16 operands, f32 accumulation) plus
    # VPU/EUP activations in f32, everything resident in VMEM.
    # x arrives as f32 from HBM; cast the tile here (no wrapper-side bf16 copy pass).
    h = x_ref[...].astype(jnp.bfloat16)
    for w_ref, b_ref in ((w1_ref, b1_ref), (w2_ref, b2_ref),
                         (w3_ref, b3_ref), (w4_ref, b4_ref)):
        a = jnp.dot(h, w_ref[...], preferred_element_type=jnp.float32) + b_ref[...]
        h = _leaky_relu(a).astype(jnp.bfloat16)   # activation in f32 (v5e-safe), bf16 MXU operand
    logits = jnp.dot(h, w5_ref[...], preferred_element_type=jnp.float32) + b5_ref[...]
    o_ref[...] = _elu(logits).astype(o_ref.dtype)  # bf16, lane-padded -> full-width unmasked vst


def _choose_tiles(B):
    """Pick (tile_b, padded_B): big MXU-filling tiles, an exact divisor when possible (so the
    batch needs no extra padding), and >=2 grid steps when B allows (v7x megacore sharding)."""
    Bp = _round_up(max(B, 1), TILE_B_ALIGN)
    tile_b = None
    for t in range(min(TILE_B_TARGET, Bp), TILE_B_ALIGN - 1, -TILE_B_ALIGN):
        if Bp % t == 0:
            tile_b = t
            break
    if tile_b is None or (tile_b < 128 and Bp > TILE_B_TARGET):
        # Divisor search degenerated (e.g. Bp = 16*prime): pad to whole target tiles instead
        # of paying hundreds of tiny grid steps.
        tile_b = min(TILE_B_TARGET, Bp)
        Bp = _round_up(Bp, tile_b)
    if Bp // tile_b == 1 and Bp >= 2 * TILE_B_ALIGN:
        # Split so dimension_semantics=("parallel",) can shard across v7x's 2 TensorCores.
        half = (Bp // 2) - (Bp // 2) % TILE_B_ALIGN
        for t in range(half, TILE_B_ALIGN - 1, -TILE_B_ALIGN):
            if Bp % t == 0:
                tile_b = t
                break
    return tile_b, Bp


def _vmem_capacity_bytes():
    try:
        info = pltpu.get_tpu_info()
        cap = int(getattr(info, "vmem_capacity_bytes", 0) or 0)
        if cap > 0:
            return cap
    except Exception:
        pass
    return 64 << 20   # conservative fallback (v7x-sized)


def _resident_spec(shape):
    # Whole array resident across the batch grid (constant index_map) -> the block never
    # changes, so single-buffer it (halves resident-weight VMEM vs. default double buffering).
    index_map = lambda i: (0, 0)
    try:
        return pl.BlockSpec(shape, index_map, pipeline_mode=pl.Buffered(1))
    except (AttributeError, TypeError):
        return pl.BlockSpec(shape, index_map)


@functools.partial(jax.jit, static_argnames=("input_dim", "output_dim"))
def mlp_forward(x, params, *, input_dim, output_dim):
    """x: [B, C, H, W] (any [B, ...] with prod(...)==input_dim). Returns [B, output_dim] f32."""
    B = x.shape[0]
    x2d = x.reshape(B, -1)  # torch.nn.Flatten (row-major)
    assert x2d.shape[1] == input_dim
    x2d = x2d.astype(jnp.float32)  # stays f32; the kernel casts per-tile to bf16

    tile_b, Bp = _choose_tiles(B)
    if Bp != B:
        x2d = jnp.pad(x2d, ((0, Bp - B), (0, 0)))

    (w1, b1), (w2, b2), (w3, b3), (w4, b4), (w5, b5) = params

    # Lane-dense output: pad the last layer's columns up to a multiple of 128 so the
    # kernel's output stores are full-width unmasked vst; slice back afterwards.
    out_pad = _round_up(output_dim, LANE)
    if out_pad != output_dim:
        w5 = jnp.pad(w5, ((0, 0), (0, out_pad - output_dim)))
        b5 = jnp.pad(b5, ((0, 0), (0, out_pad - output_dim)))

    ws = [w.astype(jnp.bfloat16) for w in (w1, w2, w3, w4, w5)]
    bs = [b.astype(jnp.float32) for b in (b1, b2, b3, b4, b5)]

    # TODO(synk): for huge input_dim (single-buffered w1 + x tile exceeding the VMEM cap,
    # roughly input_dim > ~150K on v7x / ~300K on v5e/v6e) add a K-tiled layer-1 path with an
    # extra "arbitrary" reduction grid axis and an f32 VMEM accumulator for h1.

    # Advisory cost estimate for XLA scheduling around the custom call.
    flops = 2 * Bp * (input_dim * HIDDEN + 3 * HIDDEN * HIDDEN + HIDDEN * out_pad)
    transcendentals = Bp * out_pad  # exp in the final ELU
    weight_bytes = sum(int(w.size) * 2 for w in ws) + sum(int(b.size) * 4 for b in bs)
    bytes_accessed = Bp * input_dim * 4 + weight_bytes + Bp * out_pad * 2

    # VMEM: single-buffered weights + double-buffered f32 x tile + double-buffered bf16 out.
    io_bytes = 2 * (tile_b * input_dim * 4 + tile_b * out_pad * 2)
    vmem_need = weight_bytes + io_bytes + (4 << 20)
    vmem_cap = max(32 << 20, int(_vmem_capacity_bytes() * 0.85))  # ~54MiB v7x, ~109MiB v5e/v6e
    vmem_limit = int(min(max(vmem_need, 32 << 20), vmem_cap))

    out = pl.pallas_call(
        mlp_kernel,
        out_shape=jax.ShapeDtypeStruct((Bp, out_pad), jnp.bfloat16),
        grid_spec=pltpu.PrefetchScalarGridSpec(
            num_scalar_prefetch=0,
            grid=(Bp // tile_b,),
            in_specs=[pl.BlockSpec((tile_b, input_dim), lambda i: (i, 0))]
                     + [_resident_spec(a.shape) for pair in zip(ws, bs) for a in pair],
            out_specs=pl.BlockSpec((tile_b, out_pad), lambda i: (i, 0)),
        ),
        compiler_params=pltpu.CompilerParams(
            dimension_semantics=("parallel",),   # batch axis shards across v7x's 2 TCs
            vmem_limit_bytes=vmem_limit,
        ),
        cost_estimate=pl.CostEstimate(
            flops=flops,
            transcendentals=transcendentals,
            bytes_accessed=bytes_accessed,
        ),
    )(x2d, ws[0], bs[0], ws[1], bs[1], ws[2], bs[2], ws[3], bs[3], ws[4], bs[4])

    # Slice off batch/lane padding; up-cast the (halved) bf16 writeback to f32 here.
    return out[:B, :output_dim].astype(jnp.float32)


def init_params(key, input_dim, output_dim):
    """Deterministic init mimicking nn.Linear's uniform(-1/sqrt(fan_in), 1/sqrt(fan_in)).

    Weights stored as (in_dim, out_dim) so the kernel computes x @ W + b (== torch x @ W.T + b);
    biases as (1, out_dim) for 2-D VMEM layout.
    """
    dims = [(input_dim, HIDDEN), (HIDDEN, HIDDEN), (HIDDEN, HIDDEN),
            (HIDDEN, HIDDEN), (HIDDEN, output_dim)]
    params = []
    for (fan_in, fan_out) in dims:
        key, kw, kb = jax.random.split(key, 3)
        bound = 1.0 / jnp.sqrt(jnp.float32(fan_in))
        w = jax.random.uniform(kw, (fan_in, fan_out), jnp.float32, -bound, bound)
        b = jax.random.uniform(kb, (1, fan_out), jnp.float32, -bound, bound)
        params.append((w, b))
    return params


def reference_forward(x, params, match_kernel_precision=True):
    """Pure-JAX reference of the PyTorch forward.

    With match_kernel_precision=True it applies the same bf16-operand / f32-accumulation
    mixed precision (and bf16 output rounding) the kernel uses, so the comparison stays tight.
    """
    h = x.reshape(x.shape[0], -1).astype(jnp.float32)
    (w1, b1), (w2, b2), (w3, b3), (w4, b4), (w5, b5) = params

    def mm(a, w):
        if match_kernel_precision:
            return jnp.dot(a.astype(jnp.bfloat16), w.astype(jnp.bfloat16),
                           preferred_element_type=jnp.float32)
        return a @ w

    for (w, b) in [(w1, b1), (w2, b2), (w3, b3), (w4, b4)]:
        h = mm(h, w) + b
        h = jnp.maximum(h, LEAKY_SLOPE * h)
    logits = mm(h, w5) + b5
    out = jnp.where(logits > 0.0, logits, ELU_ALPHA * (jnp.exp(logits) - 1.0))
    if match_kernel_precision:
        out = out.astype(jnp.bfloat16).astype(jnp.float32)
    return out


if __name__ == "__main__":
    key = jax.random.PRNGKey(0)
    k_x, k_p = jax.random.split(key)

    # Small shapes consistent with the module: NCHW input, flatten -> input_dim.
    B, C, H, W = 2, 4, 16, 16
    input_dim = C * H * W          # 1024
    output_dim = 32

    x = jax.random.normal(k_x, (B, C, H, W), dtype=jnp.float32)
    params = init_params(k_p, input_dim, output_dim)

    out = mlp_forward(x, params, input_dim=input_dim, output_dim=output_dim)
    out = jax.block_until_ready(out)

    ref = reference_forward(x, params, match_kernel_precision=True)
    assert out.shape == (B, output_dim)
    assert jnp.allclose(out, ref, atol=5e-3, rtol=5e-3), "mismatch vs reference"

    print("KERNEL_OK")
</pallas_src>

<mosaic_0001>
module attributes {stable_mosaic.version = 11 : i64} {
  func.func @mlp_kernel(%arg0: i32, %arg1: memref<16x1024xf32, #tpu.memory_space<vmem>>, %arg2: memref<1024x128xbf16, #tpu.memory_space<vmem>>, %arg3: memref<1x128xf32, #tpu.memory_space<vmem>>, %arg4: memref<128x128xbf16, #tpu.memory_space<vmem>>, %arg5: memref<1x128xf32, #tpu.memory_space<vmem>>, %arg6: memref<128x128xbf16, #tpu.memory_space<vmem>>, %arg7: memref<1x128xf32, #tpu.memory_space<vmem>>, %arg8: memref<128x128xbf16, #tpu.memory_space<vmem>>, %arg9: memref<1x128xf32, #tpu.memory_space<vmem>>, %arg10: memref<128x128xbf16, #tpu.memory_space<vmem>>, %arg11: memref<1x128xf32, #tpu.memory_space<vmem>>, %arg12: memref<16x128xbf16, #tpu.memory_space<vmem>>) attributes {dimension_semantics = [#tpu.dimension_semantics<parallel>], iteration_bounds = array<i64: 1>, scalar_prefetch = 0 : i64, scratch_operands = 0 : i64, tpu.core_type = #tpu.core_type<tc>, window_params = [{transform_indices = @transform_0, window_bounds = array<i64: 16, 1024>}, {pipeline_mode = #tpu.pipeline_mode<synchronous>, transform_indices = @transform_1, window_bounds = array<i64: 1024, 128>}, {pipeline_mode = #tpu.pipeline_mode<synchronous>, transform_indices = @transform_2, window_bounds = array<i64: 1, 128>}, {pipeline_mode = #tpu.pipeline_mode<synchronous>, transform_indices = @transform_3, window_bounds = array<i64: 128, 128>}, {pipeline_mode = #tpu.pipeline_mode<synchronous>, transform_indices = @transform_4, window_bounds = array<i64: 1, 128>}, {pipeline_mode = #tpu.pipeline_mode<synchronous>, transform_indices = @transform_5, window_bounds = array<i64: 128, 128>}, {pipeline_mode = #tpu.pipeline_mode<synchronous>, transform_indices = @transform_6, window_bounds = array<i64: 1, 128>}, {pipeline_mode = #tpu.pipeline_mode<synchronous>, transform_indices = @transform_7, window_bounds = array<i64: 128, 128>}, {pipeline_mode = #tpu.pipeline_mode<synchronous>, transform_indices = @transform_8, window_bounds = array<i64: 1, 128>}, {pipeline_mode = #tpu.pipeline_mode<synchronous>, transform_indices = @transform_9, window_bounds = array<i64: 128, 128>}, {pipeline_mode = #tpu.pipeline_mode<synchronous>, transform_indices = @transform_10, window_bounds = array<i64: 1, 128>}, {transform_indices = @transform_11, window_bounds = array<i64: 16, 128>}]} {
    %c0 = arith.constant 0 : index
    %c0_0 = arith.constant 0 : index
    %0 = vector.load %arg1[%c0, %c0_0] : memref<16x1024xf32, #tpu.memory_space<vmem>>, vector<16x1024xf32>
    %1 = arith.truncf %0 : vector<16x1024xf32> to vector<16x1024xbf16>
    %c0_1 = arith.constant 0 : index
    %c0_2 = arith.constant 0 : index
    %2 = vector.load %arg2[%c0_1, %c0_2] : memref<1024x128xbf16, #tpu.memory_space<vmem>>, vector<1024x128xbf16>
    %cst = arith.constant dense<0.000000e+00> : vector<16x128xf32>
    %3 = tpu.matmul %1, %2, %cst {dimension_numbers = #tpu.dot_dimension_numbers<[1], [0], [0], [1], [0, 0, 1, 1], [], []>} : vector<16x1024xbf16>, vector<1024x128xbf16>, vector<16x128xf32> -> vector<16x128xf32>
    %c0_3 = arith.constant 0 : index
    %c0_4 = arith.constant 0 : index
    %4 = vector.load %arg3[%c0_3, %c0_4] : memref<1x128xf32, #tpu.memory_space<vmem>>, vector<1x128xf32>
    %5 = vector.broadcast %4 : vector<1x128xf32> to vector<16x128xf32>
    %6 = arith.addf %3, %5 : vector<16x128xf32>
    %cst_5 = arith.constant 0.00999999977 : f32
    %7 = vector.broadcast %cst_5 : f32 to vector<16x128xf32>
    %8 = arith.mulf %7, %6 : vector<16x128xf32>
    %9 = arith.maximumf %6, %8 : vector<16x128xf32>
    %10 = arith.truncf %9 : vector<16x128xf32> to vector<16x128xbf16>
    %c0_6 = arith.constant 0 : index
    %c0_7 = arith.constant 0 : index
    %11 = vector.load %arg4[%c0_6, %c0_7] : memref<128x128xbf16, #tpu.memory_space<vmem>>, vector<128x128xbf16>
    %cst_8 = arith.constant dense<0.000000e+00> : vector<16x128xf32>
    %12 = tpu.matmul %10, %11, %cst_8 {dimension_numbers = #tpu.dot_dimension_numbers<[1], [0], [0], [1], [0, 0, 1, 1], [], []>} : vector<16x128xbf16>, vector<128x128xbf16>, vector<16x128xf32> -> vector<16x128xf32>
    %c0_9 = arith.constant 0 : index
    %c0_10 = arith.constant 0 : index
    %13 = vector.load %arg5[%c0_9, %c0_10] : memref<1x128xf32, #tpu.memory_space<vmem>>, vector<1x128xf32>
    %14 = vector.broadcast %13 : vector<1x128xf32> to vector<16x128xf32>
    %15 = arith.addf %12, %14 : vector<16x128xf32>
    %cst_11 = arith.constant 0.00999999977 : f32
    %16 = vector.broadcast %cst_11 : f32 to vector<16x128xf32>
    %17 = arith.mulf %16, %15 : vector<16x128xf32>
    %18 = arith.maximumf %15, %17 : vector<16x128xf32>
    %19 = arith.truncf %18 : vector<16x128xf32> to vector<16x128xbf16>
    %c0_12 = arith.constant 0 : index
    %c0_13 = arith.constant 0 : index
    %20 = vector.load %arg6[%c0_12, %c0_13] : memref<128x128xbf16, #tpu.memory_space<vmem>>, vector<128x128xbf16>
    %cst_14 = arith.constant dense<0.000000e+00> : vector<16x128xf32>
    %21 = tpu.matmul %19, %20, %cst_14 {dimension_numbers = #tpu.dot_dimension_numbers<[1], [0], [0], [1], [0, 0, 1, 1], [], []>} : vector<16x128xbf16>, vector<128x128xbf16>, vector<16x128xf32> -> vector<16x128xf32>
    %c0_15 = arith.constant 0 : index
    %c0_16 = arith.constant 0 : index
    %22 = vector.load %arg7[%c0_15, %c0_16] : memref<1x128xf32, #tpu.memory_space<vmem>>, vector<1x128xf32>
    %23 = vector.broadcast %22 : vector<1x128xf32> to vector<16x128xf32>
    %24 = arith.addf %21, %23 : vector<16x128xf32>
    %cst_17 = arith.constant 0.00999999977 : f32
    %25 = vector.broadcast %cst_17 : f32 to vector<16x128xf32>
    %26 = arith.mulf %25, %24 : vector<16x128xf32>
    %27 = arith.maximumf %24, %26 : vector<16x128xf32>
    %28 = arith.truncf %27 : vector<16x128xf32> to vector<16x128xbf16>
    %c0_18 = arith.constant 0 : index
    %c0_19 = arith.constant 0 : index
    %29 = vector.load %arg8[%c0_18, %c0_19] : memref<128x128xbf16, #tpu.memory_space<vmem>>, vector<128x128xbf16>
    %cst_20 = arith.constant dense<0.000000e+00> : vector<16x128xf32>
    %30 = tpu.matmul %28, %29, %cst_20 {dimension_numbers = #tpu.dot_dimension_numbers<[1], [0], [0], [1], [0, 0, 1, 1], [], []>} : vector<16x128xbf16>, vector<128x128xbf16>, vector<16x128xf32> -> vector<16x128xf32>
    %c0_21 = arith.constant 0 : index
    %c0_22 = arith.constant 0 : index
    %31 = vector.load %arg9[%c0_21, %c0_22] : memref<1x128xf32, #tpu.memory_space<vmem>>, vector<1x128xf32>
    %32 = vector.broadcast %31 : vector<1x128xf32> to vector<16x128xf32>
    %33 = arith.addf %30, %32 : vector<16x128xf32>
    %cst_23 = arith.constant 0.00999999977 : f32
    %34 = vector.broadcast %cst_23 : f32 to vector<16x128xf32>
    %35 = arith.mulf %34, %33 : vector<16x128xf32>
    %36 = arith.maximumf %33, %35 : vector<16x128xf32>
    %37 = arith.truncf %36 : vector<16x128xf32> to vector<16x128xbf16>
    %c0_24 = arith.constant 0 : index
    %c0_25 = arith.constant 0 : index
    %38 = vector.load %arg10[%c0_24, %c0_25] : memref<128x128xbf16, #tpu.memory_space<vmem>>, vector<128x128xbf16>
    %cst_26 = arith.constant dense<0.000000e+00> : vector<16x128xf32>
    %39 = tpu.matmul %37, %38, %cst_26 {dimension_numbers = #tpu.dot_dimension_numbers<[1], [0], [0], [1], [0, 0, 1, 1], [], []>} : vector<16x128xbf16>, vector<128x128xbf16>, vector<16x128xf32> -> vector<16x128xf32>
    %c0_27 = arith.constant 0 : index
    %c0_28 = arith.constant 0 : index
    %40 = vector.load %arg11[%c0_27, %c0_28] : memref<1x128xf32, #tpu.memory_space<vmem>>, vector<1x128xf32>
    %41 = vector.broadcast %40 : vector<1x128xf32> to vector<16x128xf32>
    %42 = arith.addf %39, %41 : vector<16x128xf32>
    %cst_29 = arith.constant 0.000000e+00 : f32
    %43 = vector.broadcast %cst_29 : f32 to vector<16x128xf32>
    %44 = arith.cmpf ogt, %42, %43 : vector<16x128xf32>
    %45 = math.exp %42 : vector<16x128xf32>
    %cst_30 = arith.constant 1.000000e+00 : f32
    %46 = vector.broadcast %cst_30 : f32 to vector<16x128xf32>
    %47 = arith.subf %45, %46 : vector<16x128xf32>
    %cst_31 = arith.constant 1.000000e-01 : f32
    %48 = vector.broadcast %cst_31 : f32 to vector<16x128xf32>
    %49 = arith.mulf %48, %47 : vector<16x128xf32>
    %50 = arith.select %44, %42, %49 : vector<16x128xi1>, vector<16x128xf32>
    %51 = arith.truncf %50 : vector<16x128xf32> to vector<16x128xbf16>
    %c0_32 = arith.constant 0 : index
    %c0_33 = arith.constant 0 : index
    %52 = vector.load %arg12[%c0_32, %c0_33] : memref<16x128xbf16, #tpu.memory_space<vmem>>, vector<16x128xbf16>
    tpu.vector_store %arg12[%c0_32, %c0_33], %51 {strides = array<i32>} : memref<16x128xbf16, #tpu.memory_space<vmem>>, vector<16x128xbf16>,
    return
  }
  func.func @transform_0(%arg0: i32) -> (i32, i32) {
    %c0_i32 = arith.constant 0 : i32
    %c0_i32_0 = arith.constant 0 : i32
    return %arg0, %c0_i32 : i32, i32
  }
  func.func @transform_1(%arg0: i32) -> (i32, i32) {
    %c0_i32 = arith.constant 0 : i32
    %c0_i32_0 = arith.constant 0 : i32
    %c0_i32_1 = arith.constant 0 : i32
    return %c0_i32, %c0_i32_0 : i32, i32
  }
  func.func @transform_2(%arg0: i32) -> (i32, i32) {
    %c0_i32 = arith.constant 0 : i32
    %c0_i32_0 = arith.constant 0 : i32
    %c0_i32_1 = arith.constant 0 : i32
    return %c0_i32, %c0_i32_0 : i32, i32
  }
  func.func @transform_3(%arg0: i32) -> (i32, i32) {
    %c0_i32 = arith.constant 0 : i32
    %c0_i32_0 = arith.constant 0 : i32
    %c0_i32_1 = arith.constant 0 : i32
    return %c0_i32, %c0_i32_0 : i32, i32
  }
  func.func @transform_4(%arg0: i32) -> (i32, i32) {
    %c0_i32 = arith.constant 0 : i32
    %c0_i32_0 = arith.constant 0 : i32
    %c0_i32_1 = arith.constant 0 : i32
    return %c0_i32, %c0_i32_0 : i32, i32
  }
  func.func @transform_5(%arg0: i32) -> (i32, i32) {
    %c0_i32 = arith.constant 0 : i32
    %c0_i32_0 = arith.constant 0 : i32
    %c0_i32_1 = arith.constant 0 : i32
    return %c0_i32, %c0_i32_0 : i32, i32
  }
  func.func @transform_6(%arg0: i32) -> (i32, i32) {
    %c0_i32 = arith.constant 0 : i32
    %c0_i32_0 = arith.constant 0 : i32
    %c0_i32_1 = arith.constant 0 : i32
    return %c0_i32, %c0_i32_0 : i32, i32
  }
  func.func @transform_7(%arg0: i32) -> (i32, i32) {
    %c0_i32 = arith.constant 0 : i32
    %c0_i32_0 = arith.constant 0 : i32
    %c0_i32_1 = arith.constant 0 : i32
    return %c0_i32, %c0_i32_0 : i32, i32
  }
  func.func @transform_8(%arg0: i32) -> (i32, i32) {
    %c0_i32 = arith.constant 0 : i32
    %c0_i32_0 = arith.constant 0 : i32
    %c0_i32_1 = arith.constant 0 : i32
    return %c0_i32, %c0_i32_0 : i32, i32
  }
  func.func @transform_9(%arg0: i32) -> (i32, i32) {
    %c0_i32 = arith.constant 0 : i32
    %c0_i32_0 = arith.constant 0 : i32
    %c0_i32_1 = arith.constant 0 : i32
    return %c0_i32, %c0_i32_0 : i32, i32
  }
  func.func @transform_10(%arg0: i32) -> (i32, i32) {
    %c0_i32 = arith.constant 0 : i32
    %c0_i32_0 = arith.constant 0 : i32
    %c0_i32_1 = arith.constant 0 : i32
    return %c0_i32, %c0_i32_0 : i32, i32
  }
  func.func @transform_11(%arg0: i32) -> (i32, i32) {
    %c0_i32 = arith.constant 0 : i32
    %c0_i32_0 = arith.constant 0 : i32
    return %arg0, %c0_i32 : i32, i32
  }
}

</mosaic_0001>

<bundles_post_ra>
// kernel: mlp_forward.1
= control target key start
LH: loop header
LB: loop body
LE: loop exit
PB: predicated region body
PF: predicated region fallthrough
CT: control target
= control target key end

     0   :  { %s1968_s1 = inlined_call_operand.vmem [shape: bf16[1024,128], index: 1, kind: input, shape index: {}]   ;;  %s1969_s2 = inlined_call_operand.vmem [shape: f32[1,128], index: 2, kind: input, shape index: {}]   ;;  %s1970_s0 = inlined_call_operand.vmem [shape: f32[16,1024], index: 0, kind: input, shape index: {}]   ;;  %s1971_s4 = inlined_call_operand.vmem [shape: f32[1,128], index: 4, kind: input, shape index: {}]   ;;  %s1972_s3 = inlined_call_operand.vmem [shape: bf16[128,128], index: 3, kind: input, shape index: {}]   ;;  %s1973_s5 = inlined_call_operand.vmem [shape: bf16[128,128], index: 5, kind: input, shape index: {}]   ;;  %s1974_s6 = inlined_call_operand.vmem [shape: f32[1,128], index: 6, kind: input, shape index: {}]   ;;  %s1975_s7 = inlined_call_operand.vmem [shape: bf16[128,128], index: 7, kind: input, shape index: {}]   ;;  %s1976_s8 = inlined_call_operand.vmem [shape: f32[1,128], index: 8, kind: input, shape index: {}]   ;;  %s1977_s9 = inlined_call_operand.vmem [shape: bf16[128,128], index: 9, kind: input, shape index: {}]   ;;  %s1978_s10 = inlined_call_operand.vmem [shape: f32[1,128], index: 10, kind: input, shape index: {}]   ;;  %s1979_s11 = inlined_call_operand.vmem [shape: bf16[16,128], index: 11, kind: output, shape index: {}]  }
   0x1   :  { %v1451_v0 = vld [vmem:[%s1968_s1 + $0x38] sm:$0xff]  ;;  %v1450_v4 = vld [vmem:[%s1968_s1 + $0x30] sm:$0xff]  ;;  %v1449_v8 = vld [vmem:[%s1968_s1 + $0x28] sm:$0xff] }
   0x2   :  { %v1459_v1 = vld [vmem:[%s1968_s1 + $0x78] sm:$0xff]  ;;  %578 = vmatpush.bf16.msra.mxu0 %v1451_v0  ;;  %v1458_v5 = vld [vmem:[%s1968_s1 + $0x70] sm:$0xff]  ;;  %v1457_v9 = vld [vmem:[%s1968_s1 + $0x68] sm:$0xff] }
   0x3   :  { %v1467_v2 = vld [vmem:[%s1968_s1 + $0xb8] sm:$0xff]  ;;  %592 = vmatpush.bf16.msra.mxu1 %v1459_v1  ;;  %v1466_v6 = vld [vmem:[%s1968_s1 + $0xb0] sm:$0xff]  ;;  %v1465_v10 = vld [vmem:[%s1968_s1 + $0xa8] sm:$0xff] }
   0x4   :  { %v1475_v3 = vld [vmem:[%s1968_s1 + $0xf8] sm:$0xff]  ;;  %606 = vmatpush.bf16.msra.mxu2 %v1467_v2  ;;  %v1474_v7 = vld [vmem:[%s1968_s1 + $0xf0] sm:$0xff]  ;;  %v1473_v11 = vld [vmem:[%s1968_s1 + $0xe8] sm:$0xff] }
   0x5   :  { %620 = vmatpush.bf16.msra.mxu3 %v1475_v3  ;;  %v1448_v12 = vld [vmem:[%s1968_s1 + $0x20] sm:$0xff]  ;;  %v1447_v16 = vld [vmem:[%s1968_s1 + $0x18] sm:$0xff]  ;;  %v1446_v20 = vld [vmem:[%s1968_s1 + $0x10] sm:$0xff] }
   0x6   :  { %579 = vmatpush.bf16.msra.mxu0 %v1450_v4  ;;  %v1456_v13 = vld [vmem:[%s1968_s1 + $0x60] sm:$0xff]  ;;  %v1455_v17 = vld [vmem:[%s1968_s1 + $0x58] sm:$0xff]  ;;  %v1454_v21 = vld [vmem:[%s1968_s1 + $0x50] sm:$0xff] }
   0x7   :  { %593 = vmatpush.bf16.msra.mxu1 %v1458_v5  ;;  %v1464_v14 = vld [vmem:[%s1968_s1 + $0xa0] sm:$0xff]  ;;  %v1463_v18 = vld [vmem:[%s1968_s1 + $0x98] sm:$0xff]  ;;  %v1462_v22 = vld [vmem:[%s1968_s1 + $0x90] sm:$0xff] }
   0x8   :  { %607 = vmatpush.bf16.msra.mxu2 %v1466_v6  ;;  %v1472_v15 = vld [vmem:[%s1968_s1 + $0xe0] sm:$0xff]  ;;  %v1471_v19 = vld [vmem:[%s1968_s1 + $0xd8] sm:$0xff]  ;;  %v1470_v23 = vld [vmem:[%s1968_s1 + $0xd0] sm:$0xff] }
   0x9   :  { %621 = vmatpush.bf16.msra.mxu3 %v1474_v7  ;;  %v1445_v24 = vld [vmem:[%s1968_s1 + $0x8] sm:$0xff]  ;;  %v1444_v28 = vld [vmem:[%s1968_s1] sm:$0xff]  ;;  %v1483_v32 = vld [vmem:[%s1968_s1 + $0x138] sm:$0xff] }
   0xa   :  { %580 = vmatpush.bf16.msra.mxu0 %v1449_v8  ;;  %v1453_v25 = vld [vmem:[%s1968_s1 + $0x48] sm:$0xff]  ;;  %v1452_v29 = vld [vmem:[%s1968_s1 + $0x40] sm:$0xff]  ;;  %v1491_v33 = vld [vmem:[%s1968_s1 + $0x178] sm:$0xff] }
   0xb   :  { %594 = vmatpush.bf16.msra.mxu1 %v1457_v9  ;;  %v1461_v26 = vld [vmem:[%s1968_s1 + $0x88] sm:$0xff]  ;;  %v1460_v30 = vld [vmem:[%s1968_s1 + $0x80] sm:$0xff]  ;;  %v40_v34 = vld [vmem:[%s1970_s0 + $0x10] sm:$0xff] }
   0xc   :  { %608 = vmatpush.bf16.msra.mxu2 %v1465_v10  ;;  %v1469_v27 = vld [vmem:[%s1968_s1 + $0xc8] sm:$0xff]  ;;  %v1468_v31 = vld [vmem:[%s1968_s1 + $0xc0] sm:$0xff]  ;;  %v48_v35 = vld [vmem:[%s1970_s0 + $0x50] sm:$0xff] }
   0xd   :  { %622 = vmatpush.bf16.msra.mxu3 %v1473_v11  ;;  %v38_v36 = vld [vmem:[%s1970_s0] sm:$0xff]  ;;  %v41_v38 = vld [vmem:[%s1970_s0 + $0x18] sm:$0xff]  ;;  %v39_v40 = vld [vmem:[%s1970_s0 + $0x8] sm:$0xff]  ;;  %v56_v44 = vpack.c.bf16 %v48_v35, %v40_v34 }
   0xe   :  { %581 = vmatpush.bf16.msra.mxu0 %v1448_v12  ;;  %v46_v37 = vld [vmem:[%s1970_s0 + $0x40] sm:$0xff]  ;;  %v49_v39 = vld [vmem:[%s1970_s0 + $0x58] sm:$0xff]  ;;  %v47_v41 = vld [vmem:[%s1970_s0 + $0x48] sm:$0xff] }
   0xf   :  { %595 = vmatpush.bf16.msra.mxu1 %v1456_v13  ;;  %v1499_v42 = vld [vmem:[%s1968_s1 + $0x1b8] sm:$0xff]  ;;  %v54_v45 = vpack.c.bf16 %v46_v37, %v38_v36  ;;  %v57_v46 = vpack.c.bf16 %v49_v39, %v41_v38  ;;  %v55_v47 = vpack.c.bf16 %v47_v41, %v39_v40  ;;  %v1482_v48 = vld [vmem:[%s1968_s1 + $0x130] sm:$0xff]  ;;  %v1481_v52 = vld [vmem:[%s1968_s1 + $0x128] sm:$0xff] }
  0x10   :  { %609 = vmatpush.bf16.msra.mxu2 %v1464_v14  ;;  %v1507_v43 = vld [vmem:[%s1968_s1 + $0x1f8] sm:$0xff]  ;;  %v1490_v49 = vld [vmem:[%s1968_s1 + $0x170] sm:$0xff]  ;;  %v1489_v53 = vld [vmem:[%s1968_s1 + $0x168] sm:$0xff] }
  0x11   :  { %623 = vmatpush.bf16.msra.mxu3 %v1472_v15  ;;  %v1498_v50 = vld [vmem:[%s1968_s1 + $0x1b0] sm:$0xff]  ;;  %v1497_v54 = vld [vmem:[%s1968_s1 + $0x1a8] sm:$0xff]  ;;  %v1480_v56 = vld [vmem:[%s1968_s1 + $0x120] sm:$0xff] }
  0x12   :  { %582 = vmatpush.bf16.msra.mxu0 %v1447_v16  ;;  %v1506_v51 = vld [vmem:[%s1968_s1 + $0x1f0] sm:$0xff]  ;;  %v1505_v55 = vld [vmem:[%s1968_s1 + $0x1e8] sm:$0xff]  ;;  %v1488_v57 = vld [vmem:[%s1968_s1 + $0x160] sm:$0xff] }
  0x13   :  { %596 = vmatpush.bf16.msra.mxu1 %v1455_v17  ;;  %v1496_v58 = vld [vmem:[%s1968_s1 + $0x1a0] sm:$0xff]  ;;  %v1479_v60 = vld [vmem:[%s1968_s1 + $0x118] sm:$0xff]  ;;  %v1478_v0 = vld [vmem:[%s1968_s1 + $0x110] sm:$0xff] }
  0x14   :  { %610 = vmatpush.bf16.msra.mxu2 %v1463_v18  ;;  %v1504_v59 = vld [vmem:[%s1968_s1 + $0x1e0] sm:$0xff]  ;;  %v1487_v61 = vld [vmem:[%s1968_s1 + $0x158] sm:$0xff]  ;;  %v1486_v1 = vld [vmem:[%s1968_s1 + $0x150] sm:$0xff] }
  0x15   :  { %624 = vmatpush.bf16.msra.mxu3 %v1471_v19  ;;  %v1495_v62 = vld [vmem:[%s1968_s1 + $0x198] sm:$0xff]  ;;  %v1494_v2 = vld [vmem:[%s1968_s1 + $0x190] sm:$0xff]  ;;  %v1477_v4 = vld [vmem:[%s1968_s1 + $0x108] sm:$0xff] }
  0x16   :  { %583 = vmatpush.bf16.msra.mxu0 %v1446_v20  ;;  %v1503_v63 = vld [vmem:[%s1968_s1 + $0x1d8] sm:$0xff]  ;;  %v1502_v3 = vld [vmem:[%s1968_s1 + $0x1d0] sm:$0xff]  ;;  %v1485_v5 = vld [vmem:[%s1968_s1 + $0x148] sm:$0xff] }
  0x17   :  { %597 = vmatpush.bf16.msra.mxu1 %v1454_v21  ;;  %v1493_v6 = vld [vmem:[%s1968_s1 + $0x188] sm:$0xff]  ;;  %v1476_v8 = vld [vmem:[%s1968_s1 + $0x100] sm:$0xff]  ;;  %v44_v16 = vld [vmem:[%s1970_s0 + $0x30] sm:$0xff] }
  0x18   :  { %611 = vmatpush.bf16.msra.mxu2 %v1462_v22  ;;  %v1501_v7 = vld [vmem:[%s1968_s1 + $0x1c8] sm:$0xff]  ;;  %v1484_v9 = vld [vmem:[%s1968_s1 + $0x140] sm:$0xff]  ;;  %v52_v17 = vld [vmem:[%s1970_s0 + $0x70] sm:$0xff] }
  0x19   :  { %625 = vmatpush.bf16.msra.mxu3 %v1470_v23  ;;  %v1492_v10 = vld [vmem:[%s1968_s1 + $0x180] sm:$0xff]  ;;  %v43_v14 = vld [vmem:[%s1970_s0 + $0x28] sm:$0xff]  ;;  %v45_v18 = vld [vmem:[%s1970_s0 + $0x38] sm:$0xff]  ;;  %v60_v22 = vpack.c.bf16 %v52_v17, %v44_v16 }
  0x1a   :  { %584 = vmatpush.bf16.msra.mxu0 %v1445_v24  ;;  %v1500_v11 = vld [vmem:[%s1968_s1 + $0x1c0] sm:$0xff]  ;;  %v51_v15 = vld [vmem:[%s1970_s0 + $0x68] sm:$0xff]  ;;  %v53_v19 = vld [vmem:[%s1970_s0 + $0x78] sm:$0xff] }
  0x1b   :  { %598 = vmatpush.bf16.msra.mxu1 %v1453_v25  ;;  %v42_v12 = vld [vmem:[%s1970_s0 + $0x20] sm:$0xff]  ;;  %v59_v21 = vpack.c.bf16 %v51_v15, %v43_v14  ;;  %v61_v23 = vpack.c.bf16 %v53_v19, %v45_v18  ;;  %v1515_v24 = vld [vmem:[%s1972_s3 + $0x38] sm:$0xff]  ;;  %v1514_v25 = vld [vmem:[%s1972_s3 + $0x30] sm:$0xff] }
  0x1c   :  { %612 = vmatpush.bf16.msra.mxu2 %v1461_v26  ;;  %v50_v13 = vld [vmem:[%s1970_s0 + $0x60] sm:$0xff]  ;;  %v1513_v26 = vld [vmem:[%s1972_s3 + $0x28] sm:$0xff]  ;;  %v1523_v40 = vld [vmem:[%s1973_s5 + $0x38] sm:$0xff] }
  0x1d   :  { %626 = vmatpush.bf16.msra.mxu3 %v1469_v27  ;;  %v58_v20 = vpack.c.bf16 %v50_v13, %v42_v12  ;;  %v1512_v27 = vld [vmem:[%s1972_s3 + $0x20] sm:$0xff]  ;;  %v1517_v12 = vld [vmem:[%s1973_s5 + $0x8] sm:$0xff]  ;;  %v1531_v14 = vld [vmem:[%s1975_s7 + $0x38] sm:$0xff] }
  0x1e   :  { %585 = vmatpush.bf16.msra.mxu0 %v1444_v28  ;;  %v1511_v28 = vld [vmem:[%s1972_s3 + $0x18] sm:$0xff]  ;;  %v1508_v36 = vld [vmem:[%s1972_s3] sm:$0xff]  ;;  %v1530_v15 = vld [vmem:[%s1975_s7 + $0x30] sm:$0xff] }
  0x1f   :  { %599 = vmatpush.bf16.msra.mxu1 %v1452_v29  ;;  %v1510_v29 = vld [vmem:[%s1972_s3 + $0x10] sm:$0xff]  ;;  %v1516_v13 = vld [vmem:[%s1973_s5] sm:$0xff]  ;;  %v1529_v16 = vld [vmem:[%s1975_s7 + $0x28] sm:$0xff] }
  0x20   :  { %613 = vmatpush.bf16.msra.mxu2 %v1460_v30  ;;  %v1528_v17 = vld [vmem:[%s1975_s7 + $0x20] sm:$0xff] }
  0x21   :  { %627 = vmatpush.bf16.msra.mxu3 %v1468_v31  ;;  %586 = vmatmul.bf16.vlgmr.msra.gmra.mxu0 %v54_v45  ;;  %v1546_v19 = vld [vmem:[%s1971_s4] ss:$0 sm:$0xff] }
  0x22   :  { %634 = vmatpush.bf16.msrb.mxu0 %v1483_v32  ;;  %600 = vmatmul.bf16.vlgmr.msra.gmra.mxu1 %v55_v47  ;;  %v1509_v32 = vld [vmem:[%s1972_s3 + $0x8] sm:$0xff] }
  0x23   :  { %648 = vmatpush.bf16.msrb.mxu1 %v1491_v33  ;;  %614 = vmatmul.bf16.vlgmr.msra.gmra.mxu2 %v56_v44  ;;  %v1545_v33 = vld [vmem:[%s1969_s2] ss:$0 sm:$0xff] }
  0x24   :  { %662 = vmatpush.bf16.msrb.mxu2 %v1499_v42  ;;  %628 = vmatmul.bf16.vlgmr.msra.gmra.mxu3 %v57_v46 }
  0x25   :  { %676 = vmatpush.bf16.msrb.mxu3 %v1507_v43  ;;  %v1522_v43 = vld [vmem:[%s1973_s5 + $0x30] sm:$0xff] }
  0x26   :  { %635 = vmatpush.bf16.msrb.mxu0 %v1482_v48 }
  0x27   :  { %649 = vmatpush.bf16.msrb.mxu1 %v1490_v49  ;;  %v1521_v49 = vld [vmem:[%s1973_s5 + $0x28] sm:$0xff] }
  0x28   :  { %663 = vmatpush.bf16.msrb.mxu2 %v1498_v50 }
  0x29   :  { %677 = vmatpush.bf16.msrb.mxu3 %v1506_v51 }
  0x2a   :  { %636 = vmatpush.bf16.msrb.mxu0 %v1481_v52 }
  0x2b   :  { %650 = vmatpush.bf16.msrb.mxu1 %v1489_v53 }
  0x2c   :  { %664 = vmatpush.bf16.msrb.mxu2 %v1497_v54  ;;  %v1520_v54 = vld [vmem:[%s1973_s5 + $0x20] sm:$0xff] }
  0x2d   :  { %678 = vmatpush.bf16.msrb.mxu3 %v1505_v55 }
  0x2e   :  { %637 = vmatpush.bf16.msrb.mxu0 %v1480_v56 }
  0x2f   :  { %651 = vmatpush.bf16.msrb.mxu1 %v1488_v57 }
  0x30   :  { %665 = vmatpush.bf16.msrb.mxu2 %v1496_v58 }
  0x31   :  { %679 = vmatpush.bf16.msrb.mxu3 %v1504_v59 }
  0x32   :  { %638 = vmatpush.bf16.msrb.mxu0 %v1479_v60 }
  0x33   :  { %652 = vmatpush.bf16.msrb.mxu1 %v1487_v61 }
  0x34   :  { %666 = vmatpush.bf16.msrb.mxu2 %v1495_v62 }
  0x35   :  { %680 = vmatpush.bf16.msrb.mxu3 %v1503_v63 }
  0x36   :  { %639 = vmatpush.bf16.msrb.mxu0 %v1478_v0 }
  0x37   :  { %653 = vmatpush.bf16.msrb.mxu1 %v1486_v1 }
  0x38   :  { %667 = vmatpush.bf16.msrb.mxu2 %v1494_v2 }
  0x39   :  { %681 = vmatpush.bf16.msrb.mxu3 %v1502_v3 }
  0x3a   :  { %640 = vmatpush.bf16.msrb.mxu0 %v1477_v4 }
  0x3b   :  { %654 = vmatpush.bf16.msrb.mxu1 %v1485_v5 }
  0x3c   :  { %668 = vmatpush.bf16.msrb.mxu2 %v1493_v6 }
  0x3d   :  { %682 = vmatpush.bf16.msrb.mxu3 %v1501_v7 }
  0x3e   :  { %641 = vmatpush.bf16.msrb.mxu0 %v1476_v8 }
  0x3f   :  { %655 = vmatpush.bf16.msrb.mxu1 %v1484_v9 }
  0x40   :  { %669 = vmatpush.bf16.msrb.mxu2 %v1492_v10  ;;  %v1519_v10 = vld [vmem:[%s1973_s5 + $0x18] sm:$0xff] }
  0x41   :  { %683 = vmatpush.bf16.msrb.mxu3 %v1500_v11  ;;  %642 = vmatmul.bf16.vlgmr.msrb.gmra.mxu0 %v58_v20  ;;  %v1518_v11 = vld [vmem:[%s1973_s5 + $0x10] sm:$0xff] }
  0x42   :  { %656 = vmatmul.bf16.vlgmr.msrb.gmra.mxu1 %v59_v21  ;;  %763 = vmatpush.bf16.msra.mxu0 %v1515_v24 }
  0x43   :  { %670 = vmatmul.bf16.vlgmr.msrb.gmra.mxu2 %v60_v22  ;;  %850 = vmatpush.bf16.msra.mxu1 %v1523_v40 }
  0x44   :  { %684 = vmatmul.bf16.vlgmr.msrb.gmra.mxu3 %v61_v23  ;;  %937 = vmatpush.bf16.msra.mxu2 %v1531_v14 }
  0x46   :  { %764 = vmatpush.bf16.msra.mxu0 %v1514_v25 }
  0x47   :  { %851 = vmatpush.bf16.msra.mxu1 %v1522_v43 }
  0x48   :  { %938 = vmatpush.bf16.msra.mxu2 %v1530_v15 }
  0x4a   :  { %765 = vmatpush.bf16.msra.mxu0 %v1513_v26 }
  0x4b   :  { %852 = vmatpush.bf16.msra.mxu1 %v1521_v49  ;;  %v1532_v49 = vld [vmem:[%s1977_s9] sm:$0xff] }
  0x4c   :  { %939 = vmatpush.bf16.msra.mxu2 %v1529_v16 }
  0x4e   :  { %766 = vmatpush.bf16.msra.mxu0 %v1512_v27 }
  0x4f   :  { %853 = vmatpush.bf16.msra.mxu1 %v1520_v54 }
  0x50   :  { %940 = vmatpush.bf16.msra.mxu2 %v1528_v17 }
  0x52   :  { %767 = vmatpush.bf16.msra.mxu0 %v1511_v28  ;;  %v1527_v28 = vld [vmem:[%s1975_s7 + $0x18] sm:$0xff] }
  0x53   :  { %854 = vmatpush.bf16.msra.mxu1 %v1519_v10 }
  0x54   :  { %941 = vmatpush.bf16.msra.mxu2 %v1527_v28 }
  0x56   :  { %768 = vmatpush.bf16.msra.mxu0 %v1510_v29  ;;  %v1526_v29 = vld [vmem:[%s1975_s7 + $0x10] sm:$0xff] }
  0x57   :  { %855 = vmatpush.bf16.msra.mxu1 %v1518_v11 }
  0x58   :  { %942 = vmatpush.bf16.msra.mxu2 %v1526_v29 }
  0x5a   :  { %769 = vmatpush.bf16.msra.mxu0 %v1509_v32  ;;  %v1539_v32 = vld [vmem:[%s1977_s9 + $0x38] sm:$0xff] }
  0x5b   :  { %856 = vmatpush.bf16.msra.mxu1 %v1517_v12  ;;  %1024 = vmatpush.bf16.msra.mxu3 %v1539_v32 }
  0x5e   :  { %770 = vmatpush.bf16.msra.mxu0 %v1508_v36 }
  0x5f   :  { %857 = vmatpush.bf16.msra.mxu1 %v1516_v13 }
  0x9e   :  { %v587_v30 = vpop.f32.mrf.mxu0 }
  0x9f   :  { %v601_v31 = vpop.f32.mrf.mxu1  ;;  %v588_v37 = vadd.f32 %v1545_v33, %v587_v30  ;;  %v1525_v30 = vld [vmem:[%s1975_s7 + $0x8] sm:$0xff] }
  0xa0   :  { %943 = vmatpush.bf16.msra.mxu2 %v1525_v30 }
  0xa1   :  { %v602_v39 = vadd.f32 %v601_v31, %v588_v37  ;;  %v1524_v31 = vld [vmem:[%s1975_s7] sm:$0xff] }
  0xa2   :  { %v1547_v37 = vld [vmem:[%s1974_s6] ss:$0 sm:$0xff] }
  0xa4   :  { %944 = vmatpush.bf16.msra.mxu2 %v1524_v31 }
  0xa6   :  { %v615_v34 = vpop.f32.mrf.mxu2  ;;  %v589_v38 = vpop.f32.mrf.mxu0 }
  0xa7   :  { %v629_v35 = vpop.f32.mrf.mxu3  ;;  %v603_v41 = vpop.f32.mrf.mxu1  ;;  %v590_v42 = vadd.f32 %v1545_v33, %v589_v38  ;;  %v616_v44 = vadd.f32 %v615_v34, %v602_v39  ;;  %v1538_v33 = vld [vmem:[%s1977_s9 + $0x30] sm:$0xff]  ;;  %v1537_v34 = vld [vmem:[%s1977_s9 + $0x28] sm:$0xff] }
  0xa8   :  { %1025 = vmatpush.bf16.msra.mxu3 %v1538_v33 }
  0xa9   :  { %v604_v47 = vadd.f32 %v603_v41, %v590_v42  ;;  %v630_v50 = vadd.f32 %v629_v35, %v616_v44  ;;  %v1536_v35 = vld [vmem:[%s1977_s9 + $0x20] sm:$0xff] }
  0xac   :  { %1026 = vmatpush.bf16.msra.mxu3 %v1537_v34 }
  0xae   :  { %v617_v45 = vpop.f32.mrf.mxu2 }
  0xaf   :  { %v631_v46 = vpop.f32.mrf.mxu3  ;;  %v618_v52 = vadd.f32 %v617_v45, %v604_v47  ;;  %v1534_v47 = vld [vmem:[%s1977_s9 + $0x10] sm:$0xff] }
  0xb0   :  { %1027 = vmatpush.bf16.msra.mxu3 %v1536_v35 }
  0xb1   :  { %v632_v57 = vadd.f32 %v631_v46, %v618_v52  ;;  %v1535_v46 = vld [vmem:[%s1977_s9 + $0x18] sm:$0xff] }
  0xb4   :  { %1028 = vmatpush.bf16.msra.mxu3 %v1535_v46 }
  0xb8   :  { %1029 = vmatpush.bf16.msra.mxu3 %v1534_v47 }
  0xbe   :  { %v643_v48 = vpop.f32.mrf.mxu0 }
  0xbf   :  { %v657_v51 = vpop.f32.mrf.mxu1  ;;  %v644_v53 = vadd.f32 %v643_v48, %v630_v50  ;;  %v1533_v48 = vld [vmem:[%s1977_s9 + $0x8] sm:$0xff] }
  0xc0   :  { %1030 = vmatpush.bf16.msra.mxu3 %v1533_v48 }
  0xc1   :  { %v658_v58 = vadd.f32 %v657_v51, %v644_v53  ;;  %v1548_v51 = vld [vmem:[%s1976_s8] ss:$0 sm:$0xff] }
  0xc4   :  { %1031 = vmatpush.bf16.msra.mxu3 %v1532_v49 }
  0xc6   :  { %v671_v55 = vpop.f32.mrf.mxu2  ;;  %v645_v59 = vpop.f32.mrf.mxu0 }
  0xc7   :  { %v685_v56 = vpop.f32.mrf.mxu3  ;;  %v672_v60 = vadd.f32 %v671_v55, %v658_v58  ;;  %v646_v61 = vadd.f32 %v645_v59, %v632_v57  ;;  %v659_v62 = vpop.f32.mrf.mxu1 }
  0xc9   :  { %v686_v63 = vadd.f32 %v685_v56, %v672_v60  ;;  %v660_v0 = vadd.f32 %v659_v62, %v646_v61  ;;  %v1549_v60 = vld [vmem:[%s1978_s10] ss:$0 sm:$0xff] }
  0xcb   :  { %v690_v4 = vmul.f32 0.01, %v686_v63 }
  0xcd   :  { %v692_v7 = vmax.f32 %v686_v63, %v690_v4 }
  0xce   :  { %v673_v1 = vpop.f32.mrf.mxu2 }
  0xcf   :  { %v674_v2 = vadd.f32 %v673_v1, %v660_v0  ;;  %v687_v3 = vpop.f32.mrf.mxu3 }
  0xd1   :  { %v688_v5 = vadd.f32 %v687_v3, %v674_v2 }
  0xd3   :  { %v691_v6 = vmul.f32 0.01, %v688_v5 }
  0xd5   :  { %v693_v8 = vmax.f32 %v688_v5, %v691_v6 }
  0xd7   :  { %v694_v9 = vpack.c.bf16 %v693_v8, %v692_v7 }
  0xd9   :  { %771 = vmatmul.bf16.vlgmr.msra.gmra.mxu0 %v694_v9 }
 0x156   :  { %v772_v18 = vpop.f32.mrf.mxu0 }
 0x157   :  { %v773_v20 = vadd.f32 %v1546_v19, %v772_v18 }
 0x159   :  { %v777_v22 = vmul.f32 0.01, %v773_v20 }
 0x15b   :  { %v779_v25 = vmax.f32 %v773_v20, %v777_v22 }
 0x15e   :  { %v774_v21 = vpop.f32.mrf.mxu0 }
 0x15f   :  { %v775_v23 = vadd.f32 %v1546_v19, %v774_v21 }
 0x161   :  { %v778_v24 = vmul.f32 0.01, %v775_v23 }
 0x163   :  { %v780_v26 = vmax.f32 %v775_v23, %v778_v24 }
 0x165   :  { %v781_v27 = vpack.c.bf16 %v780_v26, %v779_v25 }
 0x167   :  { %858 = vmatmul.bf16.vlgmr.msra.gmra.mxu1 %v781_v27 }
 0x1e4   :  { %v859_v36 = vpop.f32.mrf.mxu1 }
 0x1e5   :  { %v860_v38 = vadd.f32 %v1547_v37, %v859_v36 }
 0x1e7   :  { %v864_v40 = vmul.f32 0.01, %v860_v38 }
 0x1e9   :  { %v866_v43 = vmax.f32 %v860_v38, %v864_v40 }
 0x1ec   :  { %v861_v39 = vpop.f32.mrf.mxu1 }
 0x1ed   :  { %v862_v41 = vadd.f32 %v1547_v37, %v861_v39 }
 0x1ef   :  { %v865_v42 = vmul.f32 0.01, %v862_v41 }
 0x1f1   :  { %v867_v44 = vmax.f32 %v862_v41, %v865_v42 }
 0x1f3   :  { %v868_v45 = vpack.c.bf16 %v867_v44, %v866_v43 }
 0x1f5   :  { %945 = vmatmul.bf16.vlgmr.msra.gmra.mxu2 %v868_v45 }
 0x278   :  { %v946_v50 = vpop.f32.mrf.mxu2 }
 0x279   :  { %v947_v52 = vadd.f32 %v1548_v51, %v946_v50 }
 0x27b   :  { %v951_v54 = vmul.f32 0.01, %v947_v52 }
 0x27d   :  { %v953_v57 = vmax.f32 %v947_v52, %v951_v54 }
 0x280   :  { %v948_v53 = vpop.f32.mrf.mxu2 }
 0x281   :  { %v949_v55 = vadd.f32 %v1548_v51, %v948_v53 }
 0x283   :  { %v952_v56 = vmul.f32 0.01, %v949_v55 }
 0x285   :  { %v954_v58 = vmax.f32 %v949_v55, %v952_v56 }
 0x287   :  { %v955_v59 = vpack.c.bf16 %v954_v58, %v953_v57 }
 0x289   :  { %1032 = vmatmul.bf16.vlgmr.msra.gmra.mxu3 %v955_v59 }
 0x30c   :  { %v1033_v61 = vpop.f32.mrf.mxu3 }
 0x30d   :  { %v1034_v62 = vadd.f32 %v1549_v60, %v1033_v61 }
 0x30f   :  { %v1040_v63 = vmul.f32 1.442695, %v1034_v62  ;;  %vm1038_vm0 = vcmp.gt.f32.partialorder %v1034_v62, 0.0 }
 0x311   :  { %1550 = vpow2.f32 %v1040_v63 }
 0x314   :  { %v1035_v0 = vpop.f32.mrf.mxu3 }
 0x315   :  { %v1036_v1 = vadd.f32 %v1549_v60, %v1035_v0 }
 0x317   :  { %v1042_v2 = vmul.f32 1.442695, %v1036_v1  ;;  %v1551_v3 = vpop.eup %1550  ;;  %vm1039_vm1 = vcmp.gt.f32.partialorder %v1036_v1, 0.0 }
 0x318   :  { %v1442_v4 = vadd.f32 -1.0, %v1551_v3 }
 0x319   :  { %1552 = vpow2.f32 %v1042_v2 }
 0x31a   :  { %v1046_v6 = vmul.f32 0.1, %v1442_v4 }
 0x31c   :  { %v1048_v9 = vsel %vm1038_vm0, %v1034_v62, %v1046_v6 }
 0x31f   :  { %v1553_v5 = vpop.eup %1552 }
 0x320   :  { %v1443_v7 = vadd.f32 -1.0, %v1553_v5 }
 0x322   :  { %v1047_v8 = vmul.f32 0.1, %v1443_v7 }
 0x324   :  { %v1049_v10 = vsel %vm1039_vm1, %v1036_v1, %v1047_v8 }
 0x325   :  { %v1543_v11 = vpack.c.bf16 %v1049_v10, %v1048_v9 }
 0x327   :  { %1544 = vst [vmem:[%s1979_s11] sm:$0xff] %v1543_v11  }

</bundles_post_ra>
